<compile_context>
chip_gen: v7x
topology: tpu7x:2x2x1
jax: 0.10.0
libtpu: 0.0.40
codegen_flags: <defaults>
</compile_context>

<pallas_src>
import functools
import math

import jax
import jax.numpy as jnp
from jax.experimental import pallas as pl
from jax.experimental.pallas import tpu as pltpu


def _round_up(x, m):
    return (x + m - 1) // m * m


def _layernorm(x, gamma, beta, eps=1e-5):
    # PyTorch LayerNorm: biased variance, eps inside rsqrt; done in f32.
    mu = jnp.mean(x, axis=-1, keepdims=True)
    var = jnp.mean(jnp.square(x - mu), axis=-1, keepdims=True)
    return (x - mu) * jax.lax.rsqrt(var + eps) * gamma + beta


# --------------------------------------------------------------------------- #
# Kernels
# --------------------------------------------------------------------------- #

def kv_proj_kernel(enc_ref, wkv_ref, kv_ref):
    """Grid-invariant K/V projection, computed once: enc @ [Wk_all | Wv_all]."""
    kv_ref[...] = jnp.dot(enc_ref[...].astype(jnp.bfloat16), wkv_ref[...],
                          preferred_element_type=jnp.float32).astype(jnp.bfloat16)


def block_kernel(kv_ref, dec_ref, wqx_ref, wo_ref, wdd_ref, vec_ref, out_ref,
                 *, heads, a_dim):
    """Cross-attention MultiHeadBlock_WTwoSkip for one tile of decoder rows."""
    f32 = jnp.float32
    bf16 = jnp.bfloat16
    ha = heads * a_dim

    dec_f32 = dec_ref[...]                       # (rows, D), f32 for exact skips
    dec = dec_f32.astype(bf16)
    kv = kv_ref[...]                             # (N_enc, 2*H*A), already bf16

    # One matmul produces [Q_all (score scale pre-folded) | dec @ W_skip].
    # W_skip = sum_h Wo_h folds the per-head "+ decoder_x" skip algebraically:
    #   sum_h (attn_h + dec) @ Wo_h = sum_h attn_h @ Wo_h + dec @ W_skip
    qx = jnp.dot(dec, wqx_ref[...], preferred_element_type=f32)   # (rows, H*A + D)
    q_all = qx[:, :ha].astype(bf16)              # single cast for all heads
    x = qx[:, ha:] + vec_ref[0:1, :] + dec_f32   # dec@W_skip + b_o + dec (outer skip)

    attn_heads = []
    for h in range(heads):                       # static unroll (H = 4)
        lo = h * a_dim
        q_h = q_all[:, lo:lo + a_dim]                          # (rows, A)  bf16
        k_h = kv[:, lo:lo + a_dim]                             # (N_enc, A) bf16
        v_h = kv[:, ha + lo:ha + lo + a_dim]                   # (N_enc, A) bf16
        # scores without materialising k.T: contract the last dim of both.
        s = jax.lax.dot_general(q_h, k_h, (((1,), (1,)), ((), ())),
                                preferred_element_type=f32)    # (rows, N_enc)
        s = s - jnp.max(s, axis=-1, keepdims=True)
        e = jnp.exp(s)
        p = e * pl.reciprocal(jnp.sum(e, axis=-1, keepdims=True), approx=False)
        attn_heads.append(jnp.dot(p.astype(bf16), v_h,
                                  preferred_element_type=f32))  # (rows, A)

    # Batch the four per-head attn @ Wo_h into one (rows, H*A) @ (H*A, D) matmul.
    attn_cat = jnp.concatenate(attn_heads, axis=1).astype(bf16)  # (rows, H*A)
    x = x + jnp.dot(attn_cat, wo_ref[...], preferred_element_type=f32)

    # skip + LayerNorm 1
    ln1 = _layernorm(x, vec_ref[1:2, :], vec_ref[2:3, :])

    # feed-forward (Linear -> ReLU -> Linear) + skip + LayerNorm 2
    ff = jnp.dot(ln1.astype(bf16), wdd_ref[0],
                 preferred_element_type=f32) + vec_ref[3:4, :]
    ff = jnp.maximum(ff, 0.0)
    ff2 = jnp.dot(ff.astype(bf16), wdd_ref[1],
                  preferred_element_type=f32) + vec_ref[4:5, :]
    ln2 = _layernorm(ff2 + ln1, vec_ref[5:6, :], vec_ref[6:7, :])

    out_ref[...] = ln2.astype(out_ref.dtype)


def lm_head_kernel(x_ref, w_ref, out_ref):
    """lm_head tile: (rows, D) @ (D, TILE_V) -> bf16 logits tile."""
    out_ref[...] = jnp.dot(x_ref[...], w_ref[...],
                           preferred_element_type=jnp.float32).astype(out_ref.dtype)


# --------------------------------------------------------------------------- #
# Parameter repacking (load-time, one-off)
# --------------------------------------------------------------------------- #

def pack_params(raw, *, d_dim, heads, a_dim):
    """Repack PyTorch-layout parameters into kernel-friendly lane-dense slabs."""
    # The module's per-head "+ decoder_x" skip requires attention_dim == decoder_dim
    # (it is the default: attention_dim=None -> decoder_dim).
    assert a_dim == d_dim, "per-head '+decoder_x' skip requires attention_dim == decoder_dim"
    ha = heads * a_dim
    inv_scale = 1.0 / math.sqrt(d_dim)   # module divides scores by sqrt(decoder_dim)

    # stack per-head weights along the output (lane) axis -> lane-dense matmuls
    wq_all = jnp.transpose(raw["wq"], (1, 0, 2)).reshape(d_dim, ha) * inv_scale
    wk_all = jnp.transpose(raw["wk"], (1, 0, 2)).reshape(raw["wk"].shape[1], ha)
    wv_all = jnp.transpose(raw["wv"], (1, 0, 2)).reshape(raw["wv"].shape[1], ha)
    wkv = jnp.concatenate([wk_all, wv_all], axis=1)             # (E, 2*H*A)

    wo_had = raw["wo"].reshape(heads, a_dim, d_dim)             # (H, A, D)
    w_skip = jnp.sum(wo_had, axis=0)                            # sum_h Wo_h (unscaled)

    # fuse the dec @ W_skip contraction into the Q projection (one matmul per tile)
    wqx = jnp.concatenate([wq_all, w_skip], axis=1)             # (D, H*A + D)

    wdd = jnp.stack([raw["ffw"], raw["ff2w"]], axis=0)          # (2, D, D)
    vecs = jnp.concatenate(
        [raw["wob"], raw["g1"], raw["b1"], raw["ffb"], raw["ff2b"],
         raw["g2"], raw["b2"], jnp.zeros((1, d_dim), jnp.float32)], axis=0)  # (8, D)

    return {
        "wqx": wqx.astype(jnp.bfloat16),
        "wkv": wkv.astype(jnp.bfloat16),
        "wo": raw["wo"].astype(jnp.bfloat16),      # (H*A, D)
        "wdd": wdd.astype(jnp.bfloat16),
        "vecs": vecs.astype(jnp.float32),          # LayerNorm / bias math stays f32
        "wlm": raw["wlm"].astype(jnp.bfloat16),    # (D, vocab)
    }


# --------------------------------------------------------------------------- #
# Wrapper
# --------------------------------------------------------------------------- #

def multi_head_model_twoskip(encoder_x, decoder_x, packed, *, heads, a_dim, vocab,
                             block_rows=256, vocab_tile=512):
    n_enc, e_dim = encoder_x.shape
    n_dec, d_dim = decoder_x.shape
    ha = heads * a_dim

    # ---- 1) grid-invariant K/V projection, hoisted out of the row grid --------
    kv_all = pl.pallas_call(
        kv_proj_kernel,
        out_shape=jax.ShapeDtypeStruct((n_enc, 2 * ha), jnp.bfloat16),
    )(encoder_x, packed["wkv"])

    # ---- 2) row-tiled attention / FF / LN block --------------------------------
    # Row tile is a multiple of 8 (sublane); rows padded to a tile multiple so any
    # n_dec works.  At production sizes block_rows is a tunable (256-512) and the
    # "parallel" grid axis shards row tiles across TensorCores (2 on v7x).
    block_rows = min(block_rows, _round_up(n_dec, 8))
    n_dec_pad = _round_up(n_dec, block_rows)
    dec_pad = decoder_x
    if n_dec_pad != n_dec:
        dec_pad = jnp.pad(decoder_x, ((0, n_dec_pad - n_dec), (0, 0)))
    row_grid = n_dec_pad // block_rows

    ln2 = pl.pallas_call(
        functools.partial(block_kernel, heads=heads, a_dim=a_dim),
        out_shape=jax.ShapeDtypeStruct((n_dec_pad, d_dim), jnp.bfloat16),
        grid=(row_grid,),
        in_specs=[
            pl.BlockSpec((n_enc, 2 * ha), lambda i: (0, 0)),       # kv_all (invariant)
            pl.BlockSpec((block_rows, d_dim), lambda i: (i, 0)),   # decoder rows
            pl.BlockSpec((d_dim, ha + d_dim), lambda i: (0, 0)),   # [Wq*scale | W_skip]
            pl.BlockSpec((ha, d_dim), lambda i: (0, 0)),           # W_O
            pl.BlockSpec((2, d_dim, d_dim), lambda i: (0, 0, 0)),  # [FF, FF2]
            pl.BlockSpec((8, d_dim), lambda i: (0, 0)),            # bias / LN vectors
        ],
        out_specs=pl.BlockSpec((block_rows, d_dim), lambda i: (i, 0)),
        compiler_params=pltpu.CompilerParams(
            dimension_semantics=("parallel",),
            vmem_limit_bytes=32 * 1024 * 1024),
    )(kv_all, dec_pad, packed["wqx"], packed["wo"], packed["wdd"], packed["vecs"])

    # ---- 3) lm_head: weight-streaming matmul tiled over (row, vocab) -----------
    # Vocab padded to a 128-multiple tile -> unmasked lane-dense stores; bf16
    # weights and logits halve HBM traffic and the VMEM out tile (key on v7x's
    # 64 MiB physical / v5e's 16 MiB scoped VMEM).
    vocab_tile = min(vocab_tile, _round_up(vocab, 128))
    vocab_pad = _round_up(vocab, vocab_tile)
    wlm = packed["wlm"]
    if vocab_pad != vocab:
        wlm = jnp.pad(wlm, ((0, 0), (0, vocab_pad - vocab)))
    vocab_grid = vocab_pad // vocab_tile

    logits = pl.pallas_call(
        lm_head_kernel,
        out_shape=jax.ShapeDtypeStruct((n_dec_pad, vocab_pad), jnp.bfloat16),
        grid=(row_grid, vocab_grid),
        in_specs=[
            pl.BlockSpec((block_rows, d_dim), lambda i, j: (i, 0)),   # ln2 row tile
            pl.BlockSpec((d_dim, vocab_tile), lambda i, j: (0, j)),   # streamed weight tile
        ],
        out_specs=pl.BlockSpec((block_rows, vocab_tile), lambda i, j: (i, j)),
        compiler_params=pltpu.CompilerParams(
            dimension_semantics=("parallel", "parallel"),
            vmem_limit_bytes=64 * 1024 * 1024),
    )(ln2, wlm)

    return logits[:n_dec, :vocab]


# --------------------------------------------------------------------------- #
# Pure-JAX f32 reference (mirrors the PyTorch forward exactly)
# --------------------------------------------------------------------------- #

def reference_forward(encoder_x, decoder_x, raw, d_dim, heads):
    outs = []
    for h in range(heads):
        q = decoder_x @ raw["wq"][h]
        k = encoder_x @ raw["wk"][h]
        v = encoder_x @ raw["wv"][h]
        s = (q @ k.T) / math.sqrt(d_dim)          # module scales by sqrt(decoder_dim)
        p = jax.nn.softmax(s, axis=1)
        outs.append(p @ v + decoder_x)
    concat = jnp.concatenate(outs, axis=1)
    x = concat @ raw["wo"] + raw["wob"] + decoder_x
    ln1 = _layernorm(x, raw["g1"], raw["b1"])
    ff = jnp.maximum(ln1 @ raw["ffw"] + raw["ffb"], 0.0)
    ff2 = ff @ raw["ff2w"] + raw["ff2b"]
    ln2 = _layernorm(ff2 + ln1, raw["g2"], raw["b2"])
    return ln2 @ raw["wlm"]


if __name__ == "__main__":
    # Small shapes consistent with the module (attention_dim defaults to d_dim).
    # N_DEC not a multiple of 8 and VOCAB not a multiple of 128 on purpose, to
    # exercise the row-padding and vocab-padding/tiling paths.
    N_ENC, N_DEC = 16, 10
    E_DIM, D_DIM = 32, 32
    HEADS = 4
    A_DIM = D_DIM
    VOCAB = 1000   # stand-in for GPT2-XL's 50257-wide lm_head (same padding logic)

    key = jax.random.PRNGKey(0)
    ks = jax.random.split(key, 16)

    # deterministic synthetic parameters in PyTorch layout (weights pre-transposed
    # to (in, out)); 0.1-scaled gaussians keep softmax/LayerNorm well conditioned.
    raw = {
        "wq":  0.1 * jax.random.normal(ks[0], (HEADS, D_DIM, A_DIM), jnp.float32),
        "wk":  0.1 * jax.random.normal(ks[1], (HEADS, E_DIM, A_DIM), jnp.float32),
        "wv":  0.1 * jax.random.normal(ks[2], (HEADS, E_DIM, A_DIM), jnp.float32),
        "wo":  0.1 * jax.random.normal(ks[3], (A_DIM * HEADS, D_DIM), jnp.float32),
        "wob": 0.1 * jax.random.normal(ks[4], (1, D_DIM), jnp.float32),
        "g1":  jnp.ones((1, D_DIM), jnp.float32),
        "b1":  jnp.zeros((1, D_DIM), jnp.float32),
        "ffw": 0.1 * jax.random.normal(ks[5], (D_DIM, D_DIM), jnp.float32),
        "ffb": 0.1 * jax.random.normal(ks[6], (1, D_DIM), jnp.float32),
        "ff2w": 0.1 * jax.random.normal(ks[7], (D_DIM, D_DIM), jnp.float32),
        "ff2b": 0.1 * jax.random.normal(ks[8], (1, D_DIM), jnp.float32),
        "g2":  jnp.ones((1, D_DIM), jnp.float32),
        "b2":  jnp.zeros((1, D_DIM), jnp.float32),
        # TODO(synk): the real model uses GPT2-XL's pretrained lm_head (1600->50257);
        # pretrained weights cannot be loaded in-script, so a synthetic bias-free
        # linear of the same form (D_DIM -> VOCAB) stands in for it.
        "wlm": 0.1 * jax.random.normal(ks[9], (D_DIM, VOCAB), jnp.float32),
    }

    encoder_x = jax.random.normal(ks[10], (N_ENC, E_DIM), jnp.float32)
    decoder_x = jax.random.normal(ks[11], (N_DEC, D_DIM), jnp.float32)

    packed = pack_params(raw, d_dim=D_DIM, heads=HEADS, a_dim=A_DIM)
    out = multi_head_model_twoskip(encoder_x, decoder_x, packed,
                                   heads=HEADS, a_dim=A_DIM, vocab=VOCAB)
    out = jax.block_until_ready(out)

    ref = reference_forward(encoder_x, decoder_x, raw, D_DIM, HEADS)
    assert out.shape == (N_DEC, VOCAB), out.shape
    out_f32 = out.astype(jnp.float32)
    # bf16 matmul inputs / bf16 logits with f32 MXU accumulation -> loose tolerance;
    # softmax / LayerNorm / residual math is exact f32.
    err = jnp.max(jnp.abs(out_f32 - ref))
    assert jnp.allclose(out_f32, ref, atol=5e-2, rtol=5e-2), f"max abs err {err}"

    print("KERNEL_OK")
</pallas_src>

<mosaic_0001>
module attributes {stable_mosaic.version = 11 : i64} {
  func.func @kv_proj_kernel(%arg0: memref<16x32xf32, #tpu.memory_space<vmem>>, %arg1: memref<32x256xbf16, #tpu.memory_space<vmem>>, %arg2: memref<16x256xbf16, #tpu.memory_space<vmem>>) attributes {dimension_semantics = [], scalar_prefetch = 0 : i64, scratch_operands = 0 : i64, tpu.core_type = #tpu.core_type<tc>} {
    %c0 = arith.constant 0 : index
    %c0_0 = arith.constant 0 : index
    %0 = vector.load %arg0[%c0, %c0_0] : memref<16x32xf32, #tpu.memory_space<vmem>>, vector<16x32xf32>
    %1 = arith.truncf %0 : vector<16x32xf32> to vector<16x32xbf16>
    %c0_1 = arith.constant 0 : index
    %c0_2 = arith.constant 0 : index
    %2 = vector.load %arg1[%c0_1, %c0_2] : memref<32x256xbf16, #tpu.memory_space<vmem>>, vector<32x256xbf16>
    %cst = arith.constant dense<0.000000e+00> : vector<16x256xf32>
    %3 = tpu.matmul %1, %2, %cst {dimension_numbers = #tpu.dot_dimension_numbers<[1], [0], [0], [1], [0, 0, 1, 1], [], []>} : vector<16x32xbf16>, vector<32x256xbf16>, vector<16x256xf32> -> vector<16x256xf32>
    %4 = arith.truncf %3 : vector<16x256xf32> to vector<16x256xbf16>
    %c0_3 = arith.constant 0 : index
    %c0_4 = arith.constant 0 : index
    %5 = vector.load %arg2[%c0_3, %c0_4] : memref<16x256xbf16, #tpu.memory_space<vmem>>, vector<16x256xbf16>
    tpu.vector_store %arg2[%c0_3, %c0_4], %4 {strides = array<i32>} : memref<16x256xbf16, #tpu.memory_space<vmem>>, vector<16x256xbf16>,
    return
  }
}

</mosaic_0001>

<bundles_post_ra>
// kernel: tpu_custom_call.1
= control target key start
LH: loop header
LB: loop body
LE: loop exit
PB: predicated region body
PF: predicated region fallthrough
CT: control target
= control target key end

     0   :  { %7 = vsyncpa [#allocation3], 0  ;;  %s306_s0 = inlined_call_operand.hbm [shape: f32[16,32], index: 0, kind: input, shape index: {}]   ;;  %s307_s1 = inlined_call_operand.hbm [shape: bf16[32,256], index: 1, kind: input, shape index: {}]   ;;  %s308_s2 = inlined_call_operand.hbm [shape: bf16[16,256], index: 2, kind: output, shape index: {}]  }
   0x1   :  { %8 = vsyncpa [#allocation6], 0 }
   0x2   :  { %9 = vsyncpa [#allocation4], 0  ;;  %s240_s9 = smov [#allocation2]   ;;  %s168_s13 = scalar_lea.hbm %s306_s0, 256 }
   0x3   :  { %s15_s10 = sshll.u32 %s240_s9, 4  ;;  %p169_p0 = scmp.ne.s32.totalorder %s306_s0, %s168_s13  ;;  %s16_s10 = int_to_ptr.vmem [resolvable:$true] %s15_s10 }
   0x4   :  { %p172_p1 = scmp.lt.u32.totalorder %s168_s13, %s306_s0 }
   0x6   :  { %p174_p2 = pnand %p172_p1, %p169_p0 }
   0x8   :  { %177 = shalt.err (!%p174_p2)
}
   0x9   :  { %s178_s18 = scalar_lea.vmem %s16_s10, 256  ;;  %p183_p4 = scmp.lt.s32.totalorder %s16_s10, %s16_s10 }
   0xa   :  { %p179_p3 = scmp.ne.s32.totalorder %s16_s10, %s178_s18  ;;  %p184_p5 = scmp.lt.s32.totalorder %s178_s18, %s178_s18 }
   0xc   :  { %p185_p6 = por %p184_p5, %p183_p4 }
   0xe   :  { %p186_p7 = pnand %p185_p6, %p179_p3 }
  0x10   :  { %189 = shalt.err (!%p186_p7)
}
  0x11   :  { %s241_s19 = smov 128   ;;  %s242_s20 = smov 8  }
  0x12   :  { %21 = dma.hbm_to_vmem [thread:$0]  %s306_s0, 256, %s16_s10, [#allocation3], %s241_s19, %s241_s19, %s242_s20  }
  0x13   :  { %s243_s23 = smov [#allocation5]   ;;  %s190_s27 = scalar_lea.hbm %s307_s1, 512 }
  0x14   :  { %s27_s24 = sshll.u32 %s243_s23, 4  ;;  %p191_p8 = scmp.ne.s32.totalorder %s307_s1, %s190_s27  ;;  %s28_s24 = int_to_ptr.vmem [resolvable:$true] %s27_s24 }
  0x15   :  { %p194_p9 = scmp.lt.u32.totalorder %s190_s27, %s307_s1 }
  0x17   :  { %p196_p10 = pnand %p194_p9, %p191_p8 }
  0x19   :  { %199 = shalt.err (!%p196_p10)
}
  0x1a   :  { %s200_s4 = scalar_lea.vmem %s28_s24, 512  ;;  %p205_p12 = scmp.lt.s32.totalorder %s28_s24, %s28_s24 }
  0x1b   :  { %p201_p11 = scmp.ne.s32.totalorder %s28_s24, %s200_s4  ;;  %p206_p13 = scmp.lt.s32.totalorder %s200_s4, %s200_s4 }
  0x1d   :  { %p207_p0 = por %p206_p13, %p205_p12 }
  0x1f   :  { %p208_p1 = pnand %p207_p0, %p201_p11 }
  0x21   :  { %211 = shalt.err (!%p208_p1)
}
  0x22   :  { %33 = dma.hbm_to_vmem [thread:$0]  %s307_s1, 512, %s28_s24, [#allocation6], %s241_s19, %s241_s19, %s242_s20  }
  0x23   :  { %234 = dma.done.wait [#allocation3], 256  }
  0x24   :  { %235 = vsyncadd [#allocation3], 4294967040 }
  0x25   :  { %236 = dma.done.wait [#allocation6], 512  }
  0x26   :  { %237 = vsyncadd [#allocation6], 4294966784  ;;  %v244_v0 = vmov 0   ;;  %v162_v1 = vld [vmem:[#allocation5 + $0x4] ss:$8 sps:$4 sm:$0xff]   ;;  %v41_v5 = vld [vmem:[#allocation2] sm:$0xff] }
  0x27   :  { %104 = vmatprep.mubr.bf16.mxu0 %v244_v0  ;;  %v164_v2 = vld [vmem:[#allocation5] ss:$8 sps:$4 sm:$0xff]   ;;  %72 = vmatprep.subr.bf16.mxu0 %v162_v1  ;;  %v165_v3 = vld [vmem:[#allocation5 + $0x14] ss:$8 sps:$4 sm:$0xff]   ;;  %v167_v4 = vld [vmem:[#allocation5 + $0x10] ss:$8 sps:$4 sm:$0xff]  }
  0x28   :  { %73 = vmatpush1.bf16.msra.mxu0 %v164_v2  ;;  %v42_v6 = vld [vmem:[#allocation2 + $0x8] sm:$0xff]  ;;  %vm68_vm0 = vcmask 261120   ;;  %s245_s1 = smov [#allocation7]  }
  0x29   :  { %74 = vmatprep.subr.bf16.mxu0 %v165_v3  ;;  %v43_v7 = vpack.c.bf16 %v42_v6, %v41_v5  ;;  %s134_s6 = sshll.u32 %s245_s1, 4  ;;  %s135_s6 = int_to_ptr.vmem [resolvable:$true] %s134_s6 }
  0x2a   :  { %s212_s7 = scalar_lea.vmem %s135_s6, 256  ;;  %p217_p3 = scmp.lt.s32.totalorder %s135_s6, %s135_s6 }
  0x2b   :  { %p213_p2 = scmp.ne.s32.totalorder %s135_s6, %s212_s7  ;;  %p218_p4 = scmp.lt.s32.totalorder %s212_s7, %s212_s7 }
  0x2c   :  { %75 = vmatpush1.bf16.msra.mxu0 %v167_v4 }
  0x2d   :  { %p219_p5 = por %p218_p4, %p217_p3 }
  0x2f   :  { %151 = vmatmul.mubr.msk.bf16.vlgmr.msra.gmra.mrb[0].mxu0 %vm68_vm0, %v43_v7  ;;  %p220_p6 = pnand %p219_p5, %p213_p2 }
 0x102   :  { %v106_v8 = vpop.f32.mrb[0].mxu0 }
 0x103   :  { %v108_v9 = vpop.f32.mrb[1].mxu0 }
 0x104   :  { %v154_v10 = vpack.c.bf16 %v108_v9, %v106_v8  ;;  %v110_v11 = vpop.f32.mrb[2].mxu0 }
 0x105   :  { %v112_v12 = vpop.f32.mrb[3].mxu0 }
 0x106   :  { %127 = vst [vmem:[#allocation7] sm:$0xff] %v154_v10  ;;  %v155_v13 = vpack.c.bf16 %v112_v12, %v110_v11 }
 0x108   :  { %128 = vst [vmem:[#allocation7 + $0x8] sm:$0xff] %v155_v13 }
 0x109   :  { %223 = shalt.err (!%p220_p6)
}
 0x10a   :  { %s224_s10 = scalar_lea.hbm %s308_s2, 256 }
 0x10b   :  { %p225_p7 = scmp.ne.s32.totalorder %s308_s2, %s224_s10  ;;  %p228_p8 = scmp.lt.u32.totalorder %s224_s10, %s308_s2 }
 0x10d   :  { %p230_p9 = pnand %p228_p8, %p225_p7 }
 0x10f   :  { %233 = shalt.err (!%p230_p9)
}
 0x110   :  { %140 = dma.vmem_to_hbm [thread:$0]  %s135_s6, 256, %s308_s2, [#allocation4], %s241_s19, %s241_s19, %s242_s20  }
 0x111   :  { %238 = dma.done.wait [#allocation4], 256  }
 0x112   :  { %239 = vsyncadd [#allocation4], 4294967040 }
 0x113   :  { %144 = vsyncpa [#allocation3], 1 }
 0x114   :  { %145 = vsyncpa [#allocation6], 1 }
 0x115   :  { %146 = vsyncpa [#allocation4], 1 }

</bundles_post_ra>
